<compile_context>
chip_gen: v7x
topology: tpu7x:2x2x1
jax: 0.10.0
libtpu: 0.0.40
codegen_flags: <defaults>
</compile_context>

<pallas_src>
import functools

import jax
import jax.numpy as jnp
from jax.experimental import pallas as pl
from jax.experimental.pallas import tpu as pltpu


# ----------------------------------------------------------------------------
# Pallas kernel: one MXU matmul per (frame, spatial-tile)
# ----------------------------------------------------------------------------
def _ps_upconv_kernel(slab_ref, w_ref, o_ref):
    """slab_ref: (1, TILE_S, Kp) bf16 im2col tile; K ordered (ky, kx, cin) then
                 a ones column (bias) then zero padding to Kp
    w_ref:    (Cout, Kp)        bf16 weights (+ bias column), grid-resident
    o_ref:    (1, Cout, TILE_S) bf16 output tile, lane-dense (TILE_S lanes)
    """
    # (Cout, Kp) x (TILE_S, Kp)^T -> (Cout, TILE_S): output lanes = TILE_S
    # (multiple of 128) so the store below is an unmasked, lane-dense vst.
    acc = jax.lax.dot_general(
        w_ref[...], slab_ref[0],
        dimension_numbers=(((1,), (1,)), ((), ())),
        preferred_element_type=jnp.float32)            # f32 accumulation
    o_ref[0] = acc.astype(o_ref.dtype)                 # single cast + store


# ----------------------------------------------------------------------------
# Wrapper: PSUpsample.forward  (conv3x3 pad=1  ->  pixel_shuffle(scale))
# ----------------------------------------------------------------------------
def ps_upsample(x, weight, bias, *, scale_factor):
    """PyTorch PSUpsample forward.

    x:      (N, Cin, H, W)     float32, NCHW (PyTorch convention)
    weight: (Cout, Cin, 3, 3)  with Cout = out_feat * scale_factor**2
    bias:   (Cout,)
    returns (N, out_feat, H*scale_factor, W*scale_factor) float32
    """
    N, Cin, H, W = x.shape
    Cout = weight.shape[0]
    r = scale_factor
    assert weight.shape == (Cout, Cin, 3, 3)
    assert Cout % (r * r) == 0 and Cout % 8 == 0
    out_feat = Cout // (r * r)

    S = H * W
    K0 = 9 * Cin + 1                       # nine taps + folded-bias ones column
    Kp = ((K0 + 127) // 128) * 128         # pad K to lane / MXU granule

    # Spatial (lane) tiling: >= 2 tiles per frame when divisible, so each v7x
    # TensorCore gets multiple grid steps and DMAs pipeline against the MXU.
    # TODO(synk): on single-TC chips (v5e/v6e) fusing both frames into one
    # grid step would shave ~0.35us/step of pure grid overhead.
    if S % 512 == 0 and S // 512 >= 2:
        tile_s = 512
    else:
        tile_s = S
    assert S % tile_s == 0
    assert tile_s == S or tile_s % 128 == 0

    # ---- wrapper-side im2col (plain XLA): lane-dense bf16 slab --------------
    x_nhwc = jnp.transpose(x, (0, 2, 3, 1)).astype(jnp.bfloat16)   # (N,H,W,Cin)
    x_pad = jnp.pad(x_nhwc, ((0, 0), (1, 1), (1, 1), (0, 0)))      # pad=1 halo
    taps = [x_pad[:, ky:ky + H, kx:kx + W, :]
            for ky in range(3) for kx in range(3)]
    slab = jnp.concatenate(taps, axis=-1).reshape(N, S, 9 * Cin)   # (N,S,9Cin)
    ones = jnp.ones((N, S, 1), jnp.bfloat16)                       # bias column
    slab = jnp.concatenate([slab, ones], axis=-1)                  # (N,S,K0)
    slab = jnp.pad(slab, ((0, 0), (0, 0), (0, Kp - K0)))           # (N,S,Kp)

    # Weights: (Cout,Cin,3,3) -> (Cout, 9Cin) in (ky,kx,cin) order + bias col.
    w_k = jnp.transpose(weight, (0, 2, 3, 1)).reshape(Cout, 9 * Cin)
    w_k = w_k.astype(jnp.bfloat16)
    b_col = bias.reshape(Cout, 1).astype(jnp.bfloat16)
    w_ext = jnp.pad(jnp.concatenate([w_k, b_col], axis=-1),
                    ((0, 0), (0, Kp - K0)))                        # (Cout,Kp)

    # Per-step VMEM budget guard: double-buffered slab + output tiles plus the
    # resident weight block.  Constant in frame size thanks to lane tiling.
    step_bytes = (2 * tile_s * Kp * 2) + (Cout * Kp * 2) + (2 * Cout * tile_s * 2)
    assert step_bytes < 16 * 1024 * 1024, step_bytes

    flops = 2 * N * S * Cout * K0
    bytes_accessed = (N * S * Kp * 2        # bf16 slab
                      + Cout * Kp * 2       # bf16 weights (+bias)
                      + N * Cout * S * 2)   # bf16 output

    conv = pl.pallas_call(
        _ps_upconv_kernel,
        out_shape=jax.ShapeDtypeStruct((N, Cout, S), jnp.bfloat16),
        grid_spec=pltpu.PrefetchScalarGridSpec(
            num_scalar_prefetch=0,
            grid=(N, S // tile_s),
            in_specs=[
                pl.BlockSpec((1, tile_s, Kp), lambda n, s: (n, s, 0)),
                pl.BlockSpec((Cout, Kp), lambda n, s: (0, 0)),      # resident
            ],
            out_specs=pl.BlockSpec((1, Cout, tile_s), lambda n, s: (n, 0, s)),
        ),
        compiler_params=pltpu.CompilerParams(
            dimension_semantics=("parallel", "parallel"),
            vmem_limit_bytes=32 * 1024 * 1024,   # safe on v7x (64 MiB physical)
        ),
        cost_estimate=pl.CostEstimate(
            flops=flops, transcendentals=0, bytes_accessed=bytes_accessed),
    )(slab, w_ext)

    # (N, Cout, S) -> (N, Cout, H, W) -> pixel_shuffle(r) -> f32 (PyTorch dtype)
    # torch pixel_shuffle: out[n,c,h*r+i,w*r+j] = y[n, c*r*r + i*r + j, h, w]
    y = conv.reshape(N, Cout, H, W)
    y = y.reshape(N, out_feat, r, r, H, W)
    y = jnp.transpose(y, (0, 1, 4, 2, 5, 3))
    return y.reshape(N, out_feat, H * r, W * r).astype(jnp.float32)


# ----------------------------------------------------------------------------
if __name__ == "__main__":
    # Small shapes consistent with the module: batch=2, in_feat=16,
    # out_feat=16, scale_factor=2 (conv out channels = 64), 32x32 frames.
    N, in_feat, H, W = 2, 16, 32, 32
    out_feat, scale = 16, 2
    Cout = out_feat * scale * scale

    key = jax.random.PRNGKey(0)
    kx, kw, kb = jax.random.split(key, 3)
    x = jax.random.uniform(kx, (N, in_feat, H, W), jnp.float32)
    weight = 0.05 * jax.random.normal(kw, (Cout, in_feat, 3, 3), jnp.float32)
    bias = 0.05 * jax.random.normal(kb, (Cout,), jnp.float32)

    fwd = jax.jit(functools.partial(ps_upsample, scale_factor=scale))
    out = jax.block_until_ready(fwd(x, weight, bias))
    assert out.shape == (N, out_feat, H * scale, W * scale), out.shape
    assert bool(jnp.isfinite(out).all())

    # Pure-JAX reference (f32 conv over the same bf16-quantized inputs/weights).
    xr = x.astype(jnp.bfloat16).astype(jnp.float32)
    wr = weight.astype(jnp.bfloat16).astype(jnp.float32)
    conv_ref = jax.lax.conv_general_dilated(
        xr, wr, window_strides=(1, 1), padding=((1, 1), (1, 1)),
        dimension_numbers=("NCHW", "OIHW", "NCHW"))
    conv_ref = conv_ref + bias[None, :, None, None]
    ref = conv_ref.reshape(N, out_feat, scale, scale, H, W)
    ref = jnp.transpose(ref, (0, 1, 4, 2, 5, 3)).reshape(
        N, out_feat, H * scale, W * scale)
    assert bool(jnp.allclose(out, ref, atol=2e-2, rtol=2e-2)), (
        float(jnp.max(jnp.abs(out - ref))))

    print("KERNEL_OK")
</pallas_src>

<mosaic_0001>
module attributes {stable_mosaic.version = 11 : i64} {
  func.func @_ps_upconv_kernel(%arg0: i32, %arg1: i32, %arg2: memref<1x512x256xbf16, #tpu.memory_space<vmem>>, %arg3: memref<64x256xbf16, #tpu.memory_space<vmem>>, %arg4: memref<1x64x512xbf16, #tpu.memory_space<vmem>>) attributes {dimension_semantics = [#tpu.dimension_semantics<parallel>, #tpu.dimension_semantics<parallel>], iteration_bounds = array<i64: 2, 2>, scalar_prefetch = 0 : i64, scratch_operands = 0 : i64, tpu.core_type = #tpu.core_type<tc>, window_params = [{transform_indices = @transform_0, window_bounds = array<i64: 1, 512, 256>}, {pipeline_mode = #tpu.pipeline_mode<synchronous>, transform_indices = @transform_1, window_bounds = array<i64: 64, 256>}, {transform_indices = @transform_2, window_bounds = array<i64: 1, 64, 512>}]} {
    %c0 = arith.constant 0 : index
    %c0_0 = arith.constant 0 : index
    %0 = vector.load %arg3[%c0, %c0_0] : memref<64x256xbf16, #tpu.memory_space<vmem>>, vector<64x256xbf16>
    %c0_1 = arith.constant 0 : index
    %c0_2 = arith.constant 0 : index
    %c0_3 = arith.constant 0 : index
    %1 = vector.load %arg2[%c0_1, %c0_2, %c0_3] : memref<1x512x256xbf16, #tpu.memory_space<vmem>>, vector<1x512x256xbf16>
    %2 = vector.shape_cast %1 : vector<1x512x256xbf16> to vector<512x256xbf16>
    %cst = arith.constant dense<0.000000e+00> : vector<64x512xf32>
    %3 = tpu.matmul %0, %2, %cst {dimension_numbers = #tpu.dot_dimension_numbers<[1], [1], [0], [0], [0, 0, 1, 0], [], []>} : vector<64x256xbf16>, vector<512x256xbf16>, vector<64x512xf32> -> vector<64x512xf32>
    %4 = arith.truncf %3 : vector<64x512xf32> to vector<64x512xbf16>
    %c0_4 = arith.constant 0 : index
    %c0_5 = arith.constant 0 : index
    %c0_6 = arith.constant 0 : index
    %5 = vector.load %arg4[%c0_4, %c0_5, %c0_6] : memref<1x64x512xbf16, #tpu.memory_space<vmem>>, vector<1x64x512xbf16>
    %6 = vector.shape_cast %5 : vector<1x64x512xbf16> to vector<64x512xbf16>
    %7 = vector.shape_cast %4 : vector<64x512xbf16> to vector<1x64x512xbf16>
    tpu.vector_store %arg4[%c0_4, %c0_5, %c0_6], %7 {strides = array<i32>} : memref<1x64x512xbf16, #tpu.memory_space<vmem>>, vector<1x64x512xbf16>,
    return
  }
  func.func @transform_0(%arg0: i32, %arg1: i32) -> (i32, i32, i32) {
    %c0_i32 = arith.constant 0 : i32
    %c0_i32_0 = arith.constant 0 : i32
    return %arg0, %arg1, %c0_i32 : i32, i32, i32
  }
  func.func @transform_1(%arg0: i32, %arg1: i32) -> (i32, i32) {
    %c0_i32 = arith.constant 0 : i32
    %c0_i32_0 = arith.constant 0 : i32
    %c0_i32_1 = arith.constant 0 : i32
    return %c0_i32, %c0_i32_0 : i32, i32
  }
  func.func @transform_2(%arg0: i32, %arg1: i32) -> (i32, i32, i32) {
    %c0_i32 = arith.constant 0 : i32
    %c0_i32_0 = arith.constant 0 : i32
    return %arg0, %c0_i32, %arg1 : i32, i32, i32
  }
}

</mosaic_0001>

<bundles_post_ra>
// kernel: ps_upsample.1
= control target key start
LH: loop header
LB: loop body
LE: loop exit
PB: predicated region body
PF: predicated region fallthrough
CT: control target
= control target key end

     0   :  { %s1350_s9 = smov 0   ;;  %s1352_s10 = smov 0   ;;  %s1568_s0 = inlined_call_operand.vmem [shape: bf16[2,1024,256], index: 0, kind: input, shape index: {}]   ;;  %s1569_s1 = inlined_call_operand.vmem [shape: bf16[64,256], index: 1, kind: input, shape index: {}]   ;;  %s1570_s2 = inlined_call_operand.vmem [shape: bf16[2,64,1024], index: 2, kind: output, shape index: {}]  }
   0x1   :  { %s1354_s11 = smov 0   ;;  %s1356_s12 = smov 0  }
   0x2   :  { %s1358_s13 = smov 0   ;;  %s1360_s14 = smov 0  }
   0x3   :  { %s1362_s15 = smov 0  }
   0x4 LB: > { %s21_s16 = sadd.s32 1, %s1325_s13  ;;  %s24_s17 = sadd.s32 1, %s1329_s14  ;;  %s1333_s15 = sphi %s1362_s15, %s12_s15   ;;  %s1329_s14 = sphi %s1360_s14, %s1577_s14   ;;  %s1325_s13 = sphi %s1358_s13, %s1576_s13   ;;  %s1321_s12 = sphi %s1356_s12, %s1575_s12   ;;  %s1317_s11 = sphi %s1354_s11, %s1574_s11   ;;  %s1313_s10 = sphi %s1352_s10, %s1573_s10   ;;  %s1309_s9 = sphi %s1350_s9, %s1572_s9  }
   0x5   : > { %p22_p0 = scmp.ge.s32.totalorder %s21_s16, 2  ;;  %s995_s18 = sadd.s32 4294967295, %s1333_s15  }
   0x6   : > { %p92_p1 = scmp.ne.s32.totalorder %s1313_s10, %s1309_s9  ;;  %p93_p2 = scmp.eq.s32.totalorder %s995_s18, 3 }
   0x7   : > { %s1579_s16 = smov (%p22_p0, %s21_s16), 0  ;;  %s1581_s17 = smov (!%p22_p0, %s24_s17), %s1329_s14 }
   0x8   : > { %s78_s19 = ssub.s32 %s1325_s13, %s1579_s16  ;;  %p26_p3 = scmp.ge.s32.totalorder %s1581_s17, 2 }
   0x9   : > { %p999_p4 = scmp.ge.s32.totalorder %s1333_s15, 1  ;;  %p1396_p5 = por %p93_p2, %p92_p1 }
   0xa   : > { %p134_p6 = scmp.lt.s32.totalorder %s1333_s15, 5  ;;  %s1583_s17 = smov (%p26_p3, %s1581_s17), 0 }
   0xb   : > { %s77_s21 = ssub.s32 %s1329_s14, %s1583_s17  ;;  %s82_s23 = sadd.s32 1, %s1313_s10 }
   0xc   : > { %p135_p7 = pnand %p999_p4, %p134_p6  ;;  %s79_s22 = sor.u32 %s78_s19, %s77_s21 }
   0xd   : > { %p80_p8 = scmp.eq.s32.totalorder %s79_s22, 0  ;;  %s1001_s25 = sshll.u32 (!%p135_p7), %s1317_s11, 6  ;;  %v1269_v0 = vld [vmem:[%s1569_s1 + $0x4] ss:$8 sps:$4 sm:$0xff] (!%p135_p7)  }
   0xe   : > { %138 = sbr.rel (%p135_p7) target bundleno = 407 (0x197), region = 28  ;;  %p161_p9 = scmp.lt.s32.totalorder (!%p135_p7), %s1321_s12, 1  ;;  %636 = vmatprep.mubr.bf16.mxu0 (!%p135_p7), %v1269_v0  ;;  %709 = vmatprep.mubr.bf16.mxu1 (!%p135_p7), %v1269_v0 }
   0xf   : > { %s1407_s24 = scalar_select %p80_p8, %s1313_s10, %s82_s23  }
  0x10   : > { %p163_p10 = scmp.lt.s32.totalorder (!%p135_p7), %s1001_s25, 127  ;;  %s157_s5 = sand.u32 (!%p135_p7), 1, %s1309_s9  }
  0x11   : > { %s1000_s6 = sshll.u32 (!%p135_p7), %s157_s5, 7 }
  0x15   : > { %s162_s26 = scalar_select %p161_p9, %s1321_s12, 1 }
  0x16   : > { %s1585_s25 = smov (!%p163_p10, %s1001_s25), 127  ;;  %s1094_s9 = sshll.u32 (%p1396_p5), %s1317_s11, 2 }
  0x17   : > { %s1003_s27 = sshll.u32 %s162_s26, 8  ;;  %s1002_s28 = sshll.u32 %s1585_s25, 1 }
  0x18   : > { %s167_s3 = sadd.s32 %s1003_s27, %s1002_s28  ;;  %s1095_s8 = sshll.u32 (%p1396_p5), %s1321_s12, 6 }
  0x19   : > { %s1004_s4 = sshll.u32 %s167_s3, 2  ;;  %s871_s20 = sadd.s32 (%p1396_p5), %s1095_s8, %s1094_s9 }
  0x1a   : > { %s1418_s7 = scalar_lea.vmem %s1568_s0, %s1004_s4  ;;  %s1096_s18 = sshll.u32 (%p1396_p5), %s871_s20, 2 }
  0x1b   : > { %v1171_v1 = vld [vmem:[%s1418_s7 + $0x4] ss:$8 sps:$4 sm:$0xff]   ;;  %v1175_v3 = vld [vmem:[%s1418_s7] ss:$8 sps:$4 sm:$0xff]   ;;  %v1177_v5 = vld [vmem:[%s1418_s7 + $0x14] ss:$8 sps:$4 sm:$0xff]   ;;  %s873_s22 = scalar_lea.vmem (%p1396_p5), %s1570_s2, %s1096_s18 }
  0x1c   : > { %v1173_v2 = vld [vmem:[%s1418_s7 + $0x104] ss:$8 sps:$4 sm:$0xff]   ;;  %604 = vmatprep.subr.bf16.mxu0 %v1171_v1  ;;  %v1176_v4 = vld [vmem:[%s1418_s7 + $0x100] ss:$8 sps:$4 sm:$0xff]   ;;  %v1179_v6 = vld [vmem:[%s1418_s7 + $0x114] ss:$8 sps:$4 sm:$0xff]  }
  0x1d   : > { %677 = vmatprep.subr.bf16.mxu1 %v1173_v2  ;;  %605 = vmatpush1.bf16.xpose.msra.mxu0 %v1175_v3  ;;  %v1181_v7 = vld [vmem:[%s1418_s7 + $0x10] ss:$8 sps:$4 sm:$0xff]   ;;  %v1183_v9 = vld [vmem:[%s1418_s7 + $0x24] ss:$8 sps:$4 sm:$0xff]   ;;  %v1187_v11 = vld [vmem:[%s1418_s7 + $0x20] ss:$8 sps:$4 sm:$0xff]  }
  0x1e   : > { %678 = vmatpush1.bf16.xpose.msra.mxu1 %v1176_v4  ;;  %606 = vmatprep.subr.bf16.mxu0 %v1177_v5  ;;  %v1182_v8 = vld [vmem:[%s1418_s7 + $0x110] ss:$8 sps:$4 sm:$0xff]   ;;  %v1185_v10 = vld [vmem:[%s1418_s7 + $0x124] ss:$8 sps:$4 sm:$0xff]   ;;  %v1188_v12 = vld [vmem:[%s1418_s7 + $0x120] ss:$8 sps:$4 sm:$0xff]  }
  0x1f   : > { %679 = vmatprep.subr.bf16.mxu1 %v1179_v6  ;;  %v1189_v13 = vld [vmem:[%s1418_s7 + $0x34] ss:$8 sps:$4 sm:$0xff]   ;;  %v1193_v15 = vld [vmem:[%s1418_s7 + $0x30] ss:$8 sps:$4 sm:$0xff]   ;;  %v1195_v17 = vld [vmem:[%s1418_s7 + $0x44] ss:$8 sps:$4 sm:$0xff]  }
  0x20   : > { %v1191_v14 = vld [vmem:[%s1418_s7 + $0x134] ss:$8 sps:$4 sm:$0xff]   ;;  %v1194_v16 = vld [vmem:[%s1418_s7 + $0x130] ss:$8 sps:$4 sm:$0xff]   ;;  %v1197_v18 = vld [vmem:[%s1418_s7 + $0x144] ss:$8 sps:$4 sm:$0xff]  }
  0x21   : > { %v1199_v19 = vld [vmem:[%s1418_s7 + $0x40] ss:$8 sps:$4 sm:$0xff]   ;;  %v1201_v21 = vld [vmem:[%s1418_s7 + $0x54] ss:$8 sps:$4 sm:$0xff]   ;;  %v1205_v23 = vld [vmem:[%s1418_s7 + $0x50] ss:$8 sps:$4 sm:$0xff]  }
  0x22   : > { %v1200_v20 = vld [vmem:[%s1418_s7 + $0x140] ss:$8 sps:$4 sm:$0xff]   ;;  %v1203_v22 = vld [vmem:[%s1418_s7 + $0x154] ss:$8 sps:$4 sm:$0xff]   ;;  %v1206_v24 = vld [vmem:[%s1418_s7 + $0x150] ss:$8 sps:$4 sm:$0xff]  }
  0x23   : > { %v1207_v25 = vld [vmem:[%s1418_s7 + $0x64] ss:$8 sps:$4 sm:$0xff]   ;;  %v1211_v27 = vld [vmem:[%s1418_s7 + $0x60] ss:$8 sps:$4 sm:$0xff]   ;;  %v1213_v29 = vld [vmem:[%s1418_s7 + $0x74] ss:$8 sps:$4 sm:$0xff]  }
  0x24   : > { %v1209_v26 = vld [vmem:[%s1418_s7 + $0x164] ss:$8 sps:$4 sm:$0xff]   ;;  %v1212_v28 = vld [vmem:[%s1418_s7 + $0x160] ss:$8 sps:$4 sm:$0xff]   ;;  %v1215_v30 = vld [vmem:[%s1418_s7 + $0x174] ss:$8 sps:$4 sm:$0xff]  }
  0x25   : > { %607 = vmatpush1.bf16.xpose.msra.mxu0 %v1181_v7  ;;  %v1217_v31 = vld [vmem:[%s1418_s7 + $0x70] ss:$8 sps:$4 sm:$0xff]   ;;  %v1219_v33 = vld [vmem:[%s1418_s7 + $0x84] ss:$8 sps:$4 sm:$0xff]   ;;  %v1223_v35 = vld [vmem:[%s1418_s7 + $0x80] ss:$8 sps:$4 sm:$0xff]  }
  0x26   : > { %680 = vmatpush1.bf16.xpose.msra.mxu1 %v1182_v8  ;;  %608 = vmatprep.subr.bf16.mxu0 %v1183_v9  ;;  %v1218_v32 = vld [vmem:[%s1418_s7 + $0x170] ss:$8 sps:$4 sm:$0xff]   ;;  %v1221_v34 = vld [vmem:[%s1418_s7 + $0x184] ss:$8 sps:$4 sm:$0xff]   ;;  %v1224_v36 = vld [vmem:[%s1418_s7 + $0x180] ss:$8 sps:$4 sm:$0xff]  }
  0x27   : > { %681 = vmatprep.subr.bf16.mxu1 %v1185_v10  ;;  %v1225_v37 = vld [vmem:[%s1418_s7 + $0x94] ss:$8 sps:$4 sm:$0xff]   ;;  %v1229_v39 = vld [vmem:[%s1418_s7 + $0x90] ss:$8 sps:$4 sm:$0xff]   ;;  %v1231_v41 = vld [vmem:[%s1418_s7 + $0xa4] ss:$8 sps:$4 sm:$0xff]  }
  0x28   : > { %v1227_v38 = vld [vmem:[%s1418_s7 + $0x194] ss:$8 sps:$4 sm:$0xff]   ;;  %v1230_v40 = vld [vmem:[%s1418_s7 + $0x190] ss:$8 sps:$4 sm:$0xff]   ;;  %v1233_v42 = vld [vmem:[%s1418_s7 + $0x1a4] ss:$8 sps:$4 sm:$0xff]  }
  0x29   : > { %v1235_v43 = vld [vmem:[%s1418_s7 + $0xa0] ss:$8 sps:$4 sm:$0xff]   ;;  %v1237_v45 = vld [vmem:[%s1418_s7 + $0xb4] ss:$8 sps:$4 sm:$0xff]   ;;  %v1241_v47 = vld [vmem:[%s1418_s7 + $0xb0] ss:$8 sps:$4 sm:$0xff]  }
  0x2a   : > { %v1236_v44 = vld [vmem:[%s1418_s7 + $0x1a0] ss:$8 sps:$4 sm:$0xff]   ;;  %v1239_v46 = vld [vmem:[%s1418_s7 + $0x1b4] ss:$8 sps:$4 sm:$0xff]   ;;  %v1242_v48 = vld [vmem:[%s1418_s7 + $0x1b0] ss:$8 sps:$4 sm:$0xff]  }
  0x2b   : > { %v1243_v49 = vld [vmem:[%s1418_s7 + $0xc4] ss:$8 sps:$4 sm:$0xff]   ;;  %v1247_v51 = vld [vmem:[%s1418_s7 + $0xc0] ss:$8 sps:$4 sm:$0xff]   ;;  %v1249_v53 = vld [vmem:[%s1418_s7 + $0xd4] ss:$8 sps:$4 sm:$0xff]  }
  0x2c   : > { %v1245_v50 = vld [vmem:[%s1418_s7 + $0x1c4] ss:$8 sps:$4 sm:$0xff]   ;;  %v1248_v52 = vld [vmem:[%s1418_s7 + $0x1c0] ss:$8 sps:$4 sm:$0xff]   ;;  %v1251_v54 = vld [vmem:[%s1418_s7 + $0x1d4] ss:$8 sps:$4 sm:$0xff]  }
  0x2d   : > { %609 = vmatpush1.bf16.xpose.msra.mxu0 %v1187_v11  ;;  %v1253_v55 = vld [vmem:[%s1418_s7 + $0xd0] ss:$8 sps:$4 sm:$0xff]   ;;  %v1255_v57 = vld [vmem:[%s1418_s7 + $0xe4] ss:$8 sps:$4 sm:$0xff]   ;;  %v1259_v59 = vld [vmem:[%s1418_s7 + $0xe0] ss:$8 sps:$4 sm:$0xff]  }
  0x2e   : > { %682 = vmatpush1.bf16.xpose.msra.mxu1 %v1188_v12  ;;  %610 = vmatprep.subr.bf16.mxu0 %v1189_v13  ;;  %v1254_v56 = vld [vmem:[%s1418_s7 + $0x1d0] ss:$8 sps:$4 sm:$0xff]   ;;  %v1257_v58 = vld [vmem:[%s1418_s7 + $0x1e4] ss:$8 sps:$4 sm:$0xff]   ;;  %v1260_v60 = vld [vmem:[%s1418_s7 + $0x1e0] ss:$8 sps:$4 sm:$0xff]  }
  0x2f   : > { %683 = vmatprep.subr.bf16.mxu1 %v1191_v14  ;;  %v1261_v61 = vld [vmem:[%s1418_s7 + $0xf4] ss:$8 sps:$4 sm:$0xff]   ;;  %v1265_v63 = vld [vmem:[%s1418_s7 + $0xf0] ss:$8 sps:$4 sm:$0xff]   ;;  %v1267_v1 = vld [vmem:[%s1569_s1] ss:$8 sps:$4 sm:$0xff]  }
  0x30   : > { %v1263_v62 = vld [vmem:[%s1418_s7 + $0x1f4] ss:$8 sps:$4 sm:$0xff]   ;;  %v1266_v0 = vld [vmem:[%s1418_s7 + $0x1f0] ss:$8 sps:$4 sm:$0xff]   ;;  %v1273_v4 = vld [vmem:[%s1569_s1 + $0x24] ss:$8 sps:$4 sm:$0xff]  }
  0x31   : > { %v1270_v2 = vld [vmem:[%s1569_s1 + $0x14] ss:$8 sps:$4 sm:$0xff]   ;;  %v1272_v3 = vld [vmem:[%s1569_s1 + $0x10] ss:$8 sps:$4 sm:$0xff]   ;;  %v1275_v5 = vld [vmem:[%s1569_s1 + $0x20] ss:$8 sps:$4 sm:$0xff]  }
  0x32   : > { %v1276_v6 = vld [vmem:[%s1569_s1 + $0x34] ss:$8 sps:$4 sm:$0xff]   ;;  %v1278_v7 = vld [vmem:[%s1569_s1 + $0x30] ss:$8 sps:$4 sm:$0xff]   ;;  %s1506_s7 = scalar_lea.vmem [#allocation2], %s1000_s6 }
  0x35   : > { %611 = vmatpush1.bf16.xpose.msra.mxu0 %v1193_v15 }
  0x36   : > { %684 = vmatpush1.bf16.xpose.msra.mxu1 %v1194_v16  ;;  %612 = vmatprep.subr.bf16.mxu0 %v1195_v17 }
  0x37   : > { %685 = vmatprep.subr.bf16.mxu1 %v1197_v18 }
  0x3d   : > { %613 = vmatpush1.bf16.xpose.msra.mxu0 %v1199_v19 }
  0x3e   : > { %686 = vmatpush1.bf16.xpose.msra.mxu1 %v1200_v20  ;;  %614 = vmatprep.subr.bf16.mxu0 %v1201_v21 }
  0x3f   : > { %687 = vmatprep.subr.bf16.mxu1 %v1203_v22 }
  0x45   : > { %615 = vmatpush1.bf16.xpose.msra.mxu0 %v1205_v23 }
  0x46   : > { %688 = vmatpush1.bf16.xpose.msra.mxu1 %v1206_v24  ;;  %616 = vmatprep.subr.bf16.mxu0 %v1207_v25 }
  0x47   : > { %689 = vmatprep.subr.bf16.mxu1 %v1209_v26 }
  0x4d   : > { %617 = vmatpush1.bf16.xpose.msra.mxu0 %v1211_v27 }
  0x4e   : > { %690 = vmatpush1.bf16.xpose.msra.mxu1 %v1212_v28  ;;  %618 = vmatprep.subr.bf16.mxu0 %v1213_v29 }
  0x4f   : > { %691 = vmatprep.subr.bf16.mxu1 %v1215_v30 }
  0x55   : > { %619 = vmatpush1.bf16.xpose.msra.mxu0 %v1217_v31 }
  0x56   : > { %692 = vmatpush1.bf16.xpose.msra.mxu1 %v1218_v32  ;;  %620 = vmatprep.subr.bf16.mxu0 %v1219_v33 }
  0x57   : > { %693 = vmatprep.subr.bf16.mxu1 %v1221_v34 }
  0x5d   : > { %621 = vmatpush1.bf16.xpose.msra.mxu0 %v1223_v35 }
  0x5e   : > { %694 = vmatpush1.bf16.xpose.msra.mxu1 %v1224_v36  ;;  %622 = vmatprep.subr.bf16.mxu0 %v1225_v37 }
  0x5f   : > { %695 = vmatprep.subr.bf16.mxu1 %v1227_v38 }
  0x65   : > { %623 = vmatpush1.bf16.xpose.msra.mxu0 %v1229_v39 }
  0x66   : > { %696 = vmatpush1.bf16.xpose.msra.mxu1 %v1230_v40  ;;  %624 = vmatprep.subr.bf16.mxu0 %v1231_v41 }
  0x67   : > { %697 = vmatprep.subr.bf16.mxu1 %v1233_v42 }
  0x6d   : > { %625 = vmatpush1.bf16.xpose.msra.mxu0 %v1235_v43 }
  0x6e   : > { %698 = vmatpush1.bf16.xpose.msra.mxu1 %v1236_v44  ;;  %626 = vmatprep.subr.bf16.mxu0 %v1237_v45 }
  0x6f   : > { %699 = vmatprep.subr.bf16.mxu1 %v1239_v46 }
  0x75   : > { %627 = vmatpush1.bf16.xpose.msra.mxu0 %v1241_v47 }
  0x76   : > { %700 = vmatpush1.bf16.xpose.msra.mxu1 %v1242_v48  ;;  %628 = vmatprep.subr.bf16.mxu0 %v1243_v49 }
  0x77   : > { %701 = vmatprep.subr.bf16.mxu1 %v1245_v50 }
  0x7d   : > { %629 = vmatpush1.bf16.xpose.msra.mxu0 %v1247_v51 }
  0x7e   : > { %702 = vmatpush1.bf16.xpose.msra.mxu1 %v1248_v52  ;;  %630 = vmatprep.subr.bf16.mxu0 %v1249_v53 }
  0x7f   : > { %703 = vmatprep.subr.bf16.mxu1 %v1251_v54 }
  0x85   : > { %631 = vmatpush1.bf16.xpose.msra.mxu0 %v1253_v55 }
  0x86   : > { %704 = vmatpush1.bf16.xpose.msra.mxu1 %v1254_v56  ;;  %632 = vmatprep.subr.bf16.mxu0 %v1255_v57 }
  0x87   : > { %705 = vmatprep.subr.bf16.mxu1 %v1257_v58 }
  0x8d   : > { %633 = vmatpush1.bf16.xpose.msra.mxu0 %v1259_v59 }
  0x8e   : > { %706 = vmatpush1.bf16.xpose.msra.mxu1 %v1260_v60  ;;  %634 = vmatprep.subr.bf16.mxu0 %v1261_v61 }
  0x8f   : > { %707 = vmatprep.subr.bf16.mxu1 %v1263_v62 }
  0x95   : > { %635 = vmatpush1.bf16.xpose.msra.mxu0 %v1265_v63 }
  0x96   : > { %708 = vmatpush1.bf16.xpose.msra.mxu1 %v1266_v0 }
  0x9c   : > { %637 = vmatmul.mubr.bf16.vlgmr.msra.gmra.mrb[0].mxu0 %v1267_v1 }
  0x9d   : > { %710 = vmatmul.mubr.bf16.vlgmr.msra.gmra.mrb[0].mxu1 %v1267_v1  ;;  %646 = vmatprep.mubr.bf16.mxu0 %v1270_v2 }
  0x9e   : > { %719 = vmatprep.mubr.bf16.mxu1 %v1270_v2 }
  0xa4   : > { %647 = vmatmul.mubr.bf16.gmra.mrb[4].mxu0 %v1272_v3 }
  0xa5   : > { %720 = vmatmul.mubr.bf16.gmra.mrb[4].mxu1 %v1272_v3  ;;  %656 = vmatprep.mubr.bf16.mxu0 %v1273_v4 }
  0xa6   : > { %729 = vmatprep.mubr.bf16.mxu1 %v1273_v4 }
  0xac   : > { %657 = vmatmul.mubr.bf16.gmra.mrb[8].mxu0 %v1275_v5 }
  0xad   : > { %730 = vmatmul.mubr.bf16.gmra.mrb[8].mxu1 %v1275_v5  ;;  %666 = vmatprep.mubr.bf16.mxu0 %v1276_v6 }
  0xae   : > { %739 = vmatprep.mubr.bf16.mxu1 %v1276_v6 }
  0xb4   : > { %667 = vmatmul.mubr.bf16.gmra.mrb[12].mxu0 %v1278_v7 }
  0xb5   : > { %740 = vmatmul.mubr.bf16.gmra.mrb[12].mxu1 %v1278_v7 }
 0x16f   : > { %v638_v8 = vpop.f32.mrb[0].mxu0 }
 0x170   : > { %v711_v9 = vpop.f32.mrb[0].mxu1  ;;  %v640_v10 = vpop.f32.mrb[1].mxu0 }
 0x171   : > { %v713_v11 = vpop.f32.mrb[1].mxu1  ;;  %v1099_v12 = vpack.c.bf16 %v640_v10, %v638_v8  ;;  %v642_v14 = vpop.f32.mrb[2].mxu0 }
 0x172   : > { %v1100_v13 = vpack.c.bf16 %v713_v11, %v711_v9  ;;  %v715_v15 = vpop.f32.mrb[2].mxu1  ;;  %v644_v16 = vpop.f32.mrb[3].mxu0 }
 0x173   : > { %v717_v17 = vpop.f32.mrb[3].mxu1  ;;  %846 = vst [vmem:[%s1506_s7] sm:$0xff] %v1099_v12  ;;  %v1101_v18 = vpack.c.bf16 %v644_v16, %v642_v14 }
 0x174   : > { %847 = vst [vmem:[%s1506_s7 + $0x8] sm:$0xff] %v1100_v13  ;;  %v1102_v19 = vpack.c.bf16 %v717_v17, %v715_v15 }
 0x175   : > { %848 = vst [vmem:[%s1506_s7 + $0x10] sm:$0xff] %v1101_v18 }
 0x176   : > { %849 = vst [vmem:[%s1506_s7 + $0x18] sm:$0xff] %v1102_v19 }
 0x177   : > { %v648_v20 = vpop.f32.mrb[4].mxu0 }
 0x178   : > { %v721_v21 = vpop.f32.mrb[4].mxu1  ;;  %v650_v22 = vpop.f32.mrb[5].mxu0 }
 0x179   : > { %v723_v23 = vpop.f32.mrb[5].mxu1  ;;  %v1103_v24 = vpack.c.bf16 %v650_v22, %v648_v20  ;;  %v652_v26 = vpop.f32.mrb[6].mxu0 }
 0x17a   : > { %v1104_v25 = vpack.c.bf16 %v723_v23, %v721_v21  ;;  %v725_v27 = vpop.f32.mrb[6].mxu1  ;;  %v654_v28 = vpop.f32.mrb[7].mxu0  ;;  %v886_v56 = vld [vmem:[%s1506_s7] sm:$0xff] (%p1396_p5) }
 0x17b   : > { %v727_v29 = vpop.f32.mrb[7].mxu1  ;;  %850 = vst [vmem:[%s1506_s7 + $0x20] sm:$0xff] %v1103_v24  ;;  %v1105_v30 = vpack.c.bf16 %v654_v28, %v652_v26  ;;  %v888_v57 = vld [vmem:[%s1506_s7 + $0x8] sm:$0xff] (%p1396_p5)  ;;  %887 = vst [vmem:[%s873_s22] sm:$0xff] (%p1396_p5), %v886_v56 }
 0x17c   : > { %851 = vst [vmem:[%s1506_s7 + $0x28] sm:$0xff] %v1104_v25  ;;  %v1106_v31 = vpack.c.bf16 %v727_v29, %v725_v27  ;;  %v890_v58 = vld [vmem:[%s1506_s7 + $0x10] sm:$0xff] (%p1396_p5)  ;;  %889 = vst [vmem:[%s873_s22 + $0x8] sm:$0xff] (%p1396_p5), %v888_v57 }
 0x17d   : > { %852 = vst [vmem:[%s1506_s7 + $0x30] sm:$0xff] %v1105_v30  ;;  %v892_v59 = vld [vmem:[%s1506_s7 + $0x18] sm:$0xff] (%p1396_p5)  ;;  %891 = vst [vmem:[%s873_s22 + $0x20] sm:$0xff] (%p1396_p5), %v890_v58 }
 0x17e   : > { %853 = vst [vmem:[%s1506_s7 + $0x38] sm:$0xff] %v1106_v31  ;;  %893 = vst [vmem:[%s873_s22 + $0x28] sm:$0xff] (%p1396_p5), %v892_v59 }
 0x17f   : > { %v658_v32 = vpop.f32.mrb[8].mxu0 }
 0x180   : > { %v731_v33 = vpop.f32.mrb[8].mxu1  ;;  %v660_v34 = vpop.f32.mrb[9].mxu0 }
 0x181   : > { %v733_v35 = vpop.f32.mrb[9].mxu1  ;;  %v1107_v36 = vpack.c.bf16 %v660_v34, %v658_v32  ;;  %v662_v38 = vpop.f32.mrb[10].mxu0 }
 0x182   : > { %v1108_v37 = vpack.c.bf16 %v733_v35, %v731_v33  ;;  %v735_v39 = vpop.f32.mrb[10].mxu1  ;;  %v664_v40 = vpop.f32.mrb[11].mxu0  ;;  %v894_v60 = vld [vmem:[%s1506_s7 + $0x20] sm:$0xff] (%p1396_p5) }
 0x183   : > { %v737_v41 = vpop.f32.mrb[11].mxu1  ;;  %854 = vst [vmem:[%s1506_s7 + $0x40] sm:$0xff] %v1107_v36  ;;  %v1109_v42 = vpack.c.bf16 %v664_v40, %v662_v38  ;;  %v896_v61 = vld [vmem:[%s1506_s7 + $0x28] sm:$0xff] (%p1396_p5)  ;;  %895 = vst [vmem:[%s873_s22 + $0x40] sm:$0xff] (%p1396_p5), %v894_v60 }
 0x184   : > { %855 = vst [vmem:[%s1506_s7 + $0x48] sm:$0xff] %v1108_v37  ;;  %v1110_v43 = vpack.c.bf16 %v737_v41, %v735_v39  ;;  %v898_v62 = vld [vmem:[%s1506_s7 + $0x30] sm:$0xff] (%p1396_p5)  ;;  %897 = vst [vmem:[%s873_s22 + $0x48] sm:$0xff] (%p1396_p5), %v896_v61 }
 0x185   : > { %856 = vst [vmem:[%s1506_s7 + $0x50] sm:$0xff] %v1109_v42  ;;  %v900_v63 = vld [vmem:[%s1506_s7 + $0x38] sm:$0xff] (%p1396_p5)  ;;  %899 = vst [vmem:[%s873_s22 + $0x60] sm:$0xff] (%p1396_p5), %v898_v62 }
 0x186   : > { %857 = vst [vmem:[%s1506_s7 + $0x58] sm:$0xff] %v1110_v43  ;;  %901 = vst [vmem:[%s873_s22 + $0x68] sm:$0xff] (%p1396_p5), %v900_v63 }
 0x187   : > { %v668_v44 = vpop.f32.mrb[12].mxu0 }
 0x188   : > { %v741_v45 = vpop.f32.mrb[12].mxu1  ;;  %v670_v46 = vpop.f32.mrb[13].mxu0  ;;  %868 = sbr.rel (!%p1396_p5) target bundleno = 407 (0x197), region = 32 }
 0x189   : > { %v743_v47 = vpop.f32.mrb[13].mxu1  ;;  %v1111_v48 = vpack.c.bf16 %v670_v46, %v668_v44  ;;  %v672_v50 = vpop.f32.mrb[14].mxu0 }
 0x18a   : > { %v1112_v49 = vpack.c.bf16 %v743_v47, %v741_v45  ;;  %v745_v51 = vpop.f32.mrb[14].mxu1  ;;  %v674_v52 = vpop.f32.mrb[15].mxu0  ;;  %v902_v0 = vld [vmem:[%s1506_s7 + $0x40] sm:$0xff] (%p1396_p5) }
 0x18b   : > { %v747_v53 = vpop.f32.mrb[15].mxu1  ;;  %858 = vst [vmem:[%s1506_s7 + $0x60] sm:$0xff] %v1111_v48  ;;  %v1113_v54 = vpack.c.bf16 %v674_v52, %v672_v50  ;;  %v904_v1 = vld [vmem:[%s1506_s7 + $0x48] sm:$0xff] (%p1396_p5)  ;;  %903 = vst [vmem:[%s873_s22 + $0x80] sm:$0xff] (%p1396_p5), %v902_v0 }
 0x18c   : > { %859 = vst [vmem:[%s1506_s7 + $0x68] sm:$0xff] %v1112_v49  ;;  %v1114_v55 = vpack.c.bf16 %v747_v53, %v745_v51  ;;  %v906_v2 = vld [vmem:[%s1506_s7 + $0x50] sm:$0xff] (%p1396_p5)  ;;  %905 = vst [vmem:[%s873_s22 + $0x88] sm:$0xff] (%p1396_p5), %v904_v1 }
 0x18d   : > { %860 = vst [vmem:[%s1506_s7 + $0x70] sm:$0xff] %v1113_v54  ;;  %v908_v3 = vld [vmem:[%s1506_s7 + $0x58] sm:$0xff] (%p1396_p5)  ;;  %907 = vst [vmem:[%s873_s22 + $0xa0] sm:$0xff] (%p1396_p5), %v906_v2 }
 0x18e   : > { %861 = vst [vmem:[%s1506_s7 + $0x78] sm:$0xff] %v1114_v55  ;;  %909 = vst [vmem:[%s873_s22 + $0xa8] sm:$0xff] (%p1396_p5), %v908_v3 }
 0x192   : > { %v910_v4 = vld [vmem:[%s1506_s7 + $0x60] sm:$0xff] }
 0x193   : > { %v912_v5 = vld [vmem:[%s1506_s7 + $0x68] sm:$0xff]  ;;  %911 = vst [vmem:[%s873_s22 + $0xc0] sm:$0xff] %v910_v4 }
 0x194   : > { %v914_v6 = vld [vmem:[%s1506_s7 + $0x70] sm:$0xff]  ;;  %913 = vst [vmem:[%s873_s22 + $0xc8] sm:$0xff] %v912_v5 }
 0x195   : > { %915 = vst [vmem:[%s873_s22 + $0xe0] sm:$0xff] %v914_v6  ;;  %v916_v7 = vld [vmem:[%s1506_s7 + $0x78] sm:$0xff] }
 0x196   : > { %917 = vst [vmem:[%s873_s22 + $0xe8] sm:$0xff] %v916_v7 }
 0x197 PF: > { %s12_s15 = sadd.s32 1, %s1333_s15   ;;  %s1572_s9 = smov %s1313_s10 }
 0x198   : > { %p9_p11 = scmp.ge.s32.totalorder %s12_s15, 6   ;;  %s1573_s10 = smov %s1407_s24 }
 0x199   : > { %s1574_s11 = smov %s1325_s13  ;;  %s1575_s12 = smov %s1329_s14 }
 0x19a   : > { %s1576_s13 = smov %s1579_s16  ;;  %s1577_s14 = smov %s1583_s17 }
 0x19b   :  { %11 = sbr.rel (!%p9_p11) target bundleno = 4 (0x4), region = 81 }

</bundles_post_ra>
